<compile_context>
chip_gen: v7x
topology: tpu7x:2x2x1
jax: 0.10.0
libtpu: 0.0.40
codegen_flags: <defaults>
</compile_context>

<pallas_src>
import jax
import jax.numpy as jnp
from jax.experimental import pallas as pl
from jax.experimental.pallas import tpu as pltpu


def _round_up(x: int, m: int) -> int:
    return ((x + m - 1) // m) * m


def ddpg_actor_kernel(x_ref, w1_ref, b1_ref, w2_ref, b2_ref, w3_ref, b3_ref,
                      o_ref):
    """Fused 3-layer MLP on one batch tile; all operands resident in VMEM."""
    x = x_ref[...]

    h = jnp.dot(x, w1_ref[...], preferred_element_type=jnp.float32)
    h = jnp.maximum(h + b1_ref[...], 0.0)          # bias (1, 64) broadcasts

    h = jnp.dot(h.astype(w2_ref.dtype), w2_ref[...],
                preferred_element_type=jnp.float32)
    h = jnp.maximum(h + b2_ref[...], 0.0)

    h = jnp.dot(h.astype(w3_ref.dtype), w3_ref[...],
                preferred_element_type=jnp.float32)
    o_ref[...] = jnp.maximum(h + b3_ref[...], 0.0).astype(o_ref.dtype)


def ddpg_actor_forward(x, params, *, block_b: int = 4096,
                       compute_dtype=jnp.bfloat16):
    """x: (B, input_dims) -> (B, output_dims) float32.

    block_b:        batch tile size (rows per grid step).  Large tiles (2k-8k)
                    amortize the ~0.35us fixed per-step pipeline overhead.
    compute_dtype:  matmul operand dtype (default bf16).  Accumulation,
                    bias-add and ReLU stay float32 either way; pass
                    jnp.float32 for a full-precision forward.
    """
    w1, b1, w2, b2, w3, b3 = params
    B, F = x.shape
    H1 = w1.shape[1]
    H2 = w2.shape[1]
    O = w3.shape[1]

    compute_dtype = jnp.dtype(compute_dtype if compute_dtype is not None
                              else x.dtype)
    x = x.astype(compute_dtype)
    w1 = w1.astype(compute_dtype)
    w2 = w2.astype(compute_dtype)
    w3 = w3.astype(compute_dtype)
    # Biases stay f32: they are added to f32 accumulators.

    # Batch tile: multiple of 8 (sublane), capped at the (rounded) batch size.
    B8 = _round_up(B, 8)
    tb = min(_round_up(max(block_b, 8), 8), B8)
    # Keep >=2 grid steps for moderately large batches so the "parallel"
    # grid axis can shard across v7x's two TensorCores (no-op on v5e/v6e).
    if B >= 256:
        tb = min(tb, _round_up(pl.cdiv(B8, 2), 8))
    tb = max(tb, 8)
    Bp = _round_up(B, tb)
    if Bp != B:
        x = jnp.pad(x, ((0, Bp - B), (0, 0)))
    grid = (Bp // tb,)

    # Advisory cost estimate for XLA's scheduler.
    x_item = jnp.dtype(x.dtype).itemsize
    weight_bytes = sum(int(a.size) * jnp.dtype(a.dtype).itemsize
                       for a in (w1, b1, w2, b2, w3, b3))
    cost = pl.CostEstimate(
        flops=2 * Bp * (F * H1 + H1 * H2 + H2 * O),
        transcendentals=0,
        bytes_accessed=Bp * F * x_item + Bp * O * 4 + weight_bytes,
    )

    out = pl.pallas_call(
        ddpg_actor_kernel,
        out_shape=jax.ShapeDtypeStruct((Bp, O), jnp.float32),
        grid=grid,
        in_specs=[
            # x tile: new block each grid step -> double-buffered DMA.
            pl.BlockSpec((tb, F), lambda i: (i, 0)),
            # Weights / biases: constant block index -> fetched once, resident.
            pl.BlockSpec((F, H1), lambda i: (0, 0)),
            pl.BlockSpec((1, H1), lambda i: (0, 0)),
            pl.BlockSpec((H1, H2), lambda i: (0, 0)),
            pl.BlockSpec((1, H2), lambda i: (0, 0)),
            pl.BlockSpec((H2, O), lambda i: (0, 0)),
            pl.BlockSpec((1, O), lambda i: (0, 0)),
        ],
        out_specs=pl.BlockSpec((tb, O), lambda i: (i, 0)),
        compiler_params=pltpu.CompilerParams(
            dimension_semantics=("parallel",),     # megacore sharding on v7x
            vmem_limit_bytes=32 * 1024 * 1024,     # safe on v5e/v6e/v7x
        ),
        cost_estimate=cost,
    )(x, w1, b1, w2, b2, w3, b3)

    return out[:B] if Bp != B else out


def init_params(key, input_dims, output_dims):
    """Deterministic init mimicking torch.nn.Linear default U(-1/sqrt(fan_in), +)."""
    dims = [(input_dims, 64), (64, 32), (32, output_dims)]
    params = []
    for (fan_in, fan_out) in dims:
        key, kw, kb = jax.random.split(key, 3)
        bound = 1.0 / jnp.sqrt(jnp.float32(fan_in))
        w = jax.random.uniform(kw, (fan_in, fan_out), jnp.float32,
                               minval=-bound, maxval=bound)
        b = jax.random.uniform(kb, (1, fan_out), jnp.float32,
                               minval=-bound, maxval=bound)
        params.extend([w, b])
    return tuple(params)


def reference_forward(x, params):
    """Plain-JAX reference for sanity checking (eval-mode dropout = identity)."""
    w1, b1, w2, b2, w3, b3 = params
    h = jnp.maximum(x @ w1 + b1, 0.0)
    h = jnp.maximum(h @ w2 + b2, 0.0)
    return jnp.maximum(h @ w3 + b3, 0.0)


if __name__ == "__main__":
    key = jax.random.PRNGKey(0)
    k_params, k_x, k_x2 = jax.random.split(key, 3)

    batch = 8
    input_dims = 16
    output_dims = 8

    params = init_params(k_params, input_dims, output_dims)

    # Small-shape correctness check (single tile, full f32 path, tight tol).
    x = jax.random.normal(k_x, (batch, input_dims), jnp.float32)
    out = jax.block_until_ready(
        ddpg_actor_forward(x, params, compute_dtype=jnp.float32))
    ref = reference_forward(x, params)
    assert out.shape == (batch, output_dims)
    assert jnp.allclose(out, ref, atol=1e-5, rtol=1e-5), "fp32 mismatch vs reference"

    # Larger batch (not a tile multiple) exercises the >=2-step grid + padding
    # path with the default bf16 compute dtype.
    big_b = 1000
    xb = jax.random.normal(k_x2, (big_b, input_dims), jnp.float32)
    outb = jax.block_until_ready(ddpg_actor_forward(xb, params))
    refb = reference_forward(xb, params)
    assert outb.shape == (big_b, output_dims)
    assert jnp.allclose(outb, refb, atol=1e-1, rtol=1e-1), "bf16 tiled mismatch"

    # Same batch, explicit f32 compute path, tight tolerance.
    outb32 = jax.block_until_ready(
        ddpg_actor_forward(xb, params, compute_dtype=jnp.float32))
    assert outb32.shape == (big_b, output_dims)
    assert jnp.allclose(outb32, refb, atol=1e-4, rtol=1e-4), "fp32 tiled mismatch"

    print("KERNEL_OK")
</pallas_src>

<mosaic_0001>
module attributes {stable_mosaic.version = 11 : i64} {
  func.func @ddpg_actor_kernel(%arg0: i32, %arg1: memref<8x16xf32, #tpu.memory_space<vmem>>, %arg2: memref<16x64xf32, #tpu.memory_space<vmem>>, %arg3: memref<1x64xf32, #tpu.memory_space<vmem>>, %arg4: memref<64x32xf32, #tpu.memory_space<vmem>>, %arg5: memref<1x32xf32, #tpu.memory_space<vmem>>, %arg6: memref<32x8xf32, #tpu.memory_space<vmem>>, %arg7: memref<1x8xf32, #tpu.memory_space<vmem>>, %arg8: memref<8x8xf32, #tpu.memory_space<vmem>>) attributes {dimension_semantics = [#tpu.dimension_semantics<parallel>], iteration_bounds = array<i64: 1>, scalar_prefetch = 0 : i64, scratch_operands = 0 : i64, tpu.core_type = #tpu.core_type<tc>, window_params = [{transform_indices = @transform_0, window_bounds = array<i64: 8, 16>}, {pipeline_mode = #tpu.pipeline_mode<synchronous>, transform_indices = @transform_1, window_bounds = array<i64: 16, 64>}, {pipeline_mode = #tpu.pipeline_mode<synchronous>, transform_indices = @transform_2, window_bounds = array<i64: 1, 64>}, {pipeline_mode = #tpu.pipeline_mode<synchronous>, transform_indices = @transform_3, window_bounds = array<i64: 64, 32>}, {pipeline_mode = #tpu.pipeline_mode<synchronous>, transform_indices = @transform_4, window_bounds = array<i64: 1, 32>}, {pipeline_mode = #tpu.pipeline_mode<synchronous>, transform_indices = @transform_5, window_bounds = array<i64: 32, 8>}, {pipeline_mode = #tpu.pipeline_mode<synchronous>, transform_indices = @transform_6, window_bounds = array<i64: 1, 8>}, {transform_indices = @transform_7, window_bounds = array<i64: 8, 8>}]} {
    %c0 = arith.constant 0 : index
    %c0_0 = arith.constant 0 : index
    %0 = vector.load %arg1[%c0, %c0_0] : memref<8x16xf32, #tpu.memory_space<vmem>>, vector<8x16xf32>
    %c0_1 = arith.constant 0 : index
    %c0_2 = arith.constant 0 : index
    %1 = vector.load %arg2[%c0_1, %c0_2] : memref<16x64xf32, #tpu.memory_space<vmem>>, vector<16x64xf32>
    %cst = arith.constant dense<0.000000e+00> : vector<8x64xf32>
    %2 = tpu.matmul %0, %1, %cst {dimension_numbers = #tpu.dot_dimension_numbers<[1], [0], [0], [1], [0, 0, 1, 1], [], []>} : vector<8x16xf32>, vector<16x64xf32>, vector<8x64xf32> -> vector<8x64xf32>
    %c0_3 = arith.constant 0 : index
    %c0_4 = arith.constant 0 : index
    %3 = vector.load %arg3[%c0_3, %c0_4] : memref<1x64xf32, #tpu.memory_space<vmem>>, vector<1x64xf32>
    %4 = vector.broadcast %3 : vector<1x64xf32> to vector<8x64xf32>
    %5 = arith.addf %2, %4 : vector<8x64xf32>
    %cst_5 = arith.constant 0.000000e+00 : f32
    %6 = vector.broadcast %cst_5 : f32 to vector<8x64xf32>
    %7 = arith.maximumf %5, %6 : vector<8x64xf32>
    %c0_6 = arith.constant 0 : index
    %c0_7 = arith.constant 0 : index
    %8 = vector.load %arg4[%c0_6, %c0_7] : memref<64x32xf32, #tpu.memory_space<vmem>>, vector<64x32xf32>
    %cst_8 = arith.constant dense<0.000000e+00> : vector<8x32xf32>
    %9 = tpu.matmul %7, %8, %cst_8 {dimension_numbers = #tpu.dot_dimension_numbers<[1], [0], [0], [1], [0, 0, 1, 1], [], []>} : vector<8x64xf32>, vector<64x32xf32>, vector<8x32xf32> -> vector<8x32xf32>
    %c0_9 = arith.constant 0 : index
    %c0_10 = arith.constant 0 : index
    %10 = vector.load %arg5[%c0_9, %c0_10] : memref<1x32xf32, #tpu.memory_space<vmem>>, vector<1x32xf32>
    %11 = vector.broadcast %10 : vector<1x32xf32> to vector<8x32xf32>
    %12 = arith.addf %9, %11 : vector<8x32xf32>
    %cst_11 = arith.constant 0.000000e+00 : f32
    %13 = vector.broadcast %cst_11 : f32 to vector<8x32xf32>
    %14 = arith.maximumf %12, %13 : vector<8x32xf32>
    %c0_12 = arith.constant 0 : index
    %c0_13 = arith.constant 0 : index
    %15 = vector.load %arg6[%c0_12, %c0_13] : memref<32x8xf32, #tpu.memory_space<vmem>>, vector<32x8xf32>
    %cst_14 = arith.constant dense<0.000000e+00> : vector<8x8xf32>
    %16 = tpu.matmul %14, %15, %cst_14 {dimension_numbers = #tpu.dot_dimension_numbers<[1], [0], [0], [1], [0, 0, 1, 1], [], []>} : vector<8x32xf32>, vector<32x8xf32>, vector<8x8xf32> -> vector<8x8xf32>
    %c0_15 = arith.constant 0 : index
    %c0_16 = arith.constant 0 : index
    %17 = vector.load %arg7[%c0_15, %c0_16] : memref<1x8xf32, #tpu.memory_space<vmem>>, vector<1x8xf32>
    %18 = vector.broadcast %17 : vector<1x8xf32> to vector<8x8xf32>
    %19 = arith.addf %16, %18 : vector<8x8xf32>
    %cst_17 = arith.constant 0.000000e+00 : f32
    %20 = vector.broadcast %cst_17 : f32 to vector<8x8xf32>
    %21 = arith.maximumf %19, %20 : vector<8x8xf32>
    %c0_18 = arith.constant 0 : index
    %c0_19 = arith.constant 0 : index
    %22 = vector.load %arg8[%c0_18, %c0_19] : memref<8x8xf32, #tpu.memory_space<vmem>>, vector<8x8xf32>
    tpu.vector_store %arg8[%c0_18, %c0_19], %21 {strides = array<i32>} : memref<8x8xf32, #tpu.memory_space<vmem>>, vector<8x8xf32>,
    return
  }
  func.func @transform_0(%arg0: i32) -> (i32, i32) {
    %c0_i32 = arith.constant 0 : i32
    %c0_i32_0 = arith.constant 0 : i32
    return %arg0, %c0_i32 : i32, i32
  }
  func.func @transform_1(%arg0: i32) -> (i32, i32) {
    %c0_i32 = arith.constant 0 : i32
    %c0_i32_0 = arith.constant 0 : i32
    %c0_i32_1 = arith.constant 0 : i32
    return %c0_i32, %c0_i32_0 : i32, i32
  }
  func.func @transform_2(%arg0: i32) -> (i32, i32) {
    %c0_i32 = arith.constant 0 : i32
    %c0_i32_0 = arith.constant 0 : i32
    %c0_i32_1 = arith.constant 0 : i32
    return %c0_i32, %c0_i32_0 : i32, i32
  }
  func.func @transform_3(%arg0: i32) -> (i32, i32) {
    %c0_i32 = arith.constant 0 : i32
    %c0_i32_0 = arith.constant 0 : i32
    %c0_i32_1 = arith.constant 0 : i32
    return %c0_i32, %c0_i32_0 : i32, i32
  }
  func.func @transform_4(%arg0: i32) -> (i32, i32) {
    %c0_i32 = arith.constant 0 : i32
    %c0_i32_0 = arith.constant 0 : i32
    %c0_i32_1 = arith.constant 0 : i32
    return %c0_i32, %c0_i32_0 : i32, i32
  }
  func.func @transform_5(%arg0: i32) -> (i32, i32) {
    %c0_i32 = arith.constant 0 : i32
    %c0_i32_0 = arith.constant 0 : i32
    %c0_i32_1 = arith.constant 0 : i32
    return %c0_i32, %c0_i32_0 : i32, i32
  }
  func.func @transform_6(%arg0: i32) -> (i32, i32) {
    %c0_i32 = arith.constant 0 : i32
    %c0_i32_0 = arith.constant 0 : i32
    %c0_i32_1 = arith.constant 0 : i32
    return %c0_i32, %c0_i32_0 : i32, i32
  }
  func.func @transform_7(%arg0: i32) -> (i32, i32) {
    %c0_i32 = arith.constant 0 : i32
    %c0_i32_0 = arith.constant 0 : i32
    return %arg0, %c0_i32 : i32, i32
  }
}

</mosaic_0001>

<bundles_post_ra>
// kernel: tpu_custom_call.1
= control target key start
LH: loop header
LB: loop body
LE: loop exit
PB: predicated region body
PF: predicated region fallthrough
CT: control target
= control target key end

     0   :  { %v413_v2 = vmov 0.0|0.0   ;;  %vm414_vm0 = vmmov 0   ;;  %v415_v4 = vmov 0.0   ;;  %vm37_vm1 = vcmask 130048   ;;  %s526_s0 = inlined_call_operand.vmem [shape: f32[8,16], index: 0, kind: input, shape index: {}]   ;;  %s527_s1 = inlined_call_operand.vmem [shape: f32[16,64], index: 1, kind: input, shape index: {}]   ;;  %s528_s2 = inlined_call_operand.vmem [shape: f32[1,64], index: 2, kind: input, shape index: {}]   ;;  %s529_s3 = inlined_call_operand.vmem [shape: f32[64,32], index: 3, kind: input, shape index: {}]   ;;  %s530_s4 = inlined_call_operand.vmem [shape: f32[1,32], index: 4, kind: input, shape index: {}]   ;;  %s531_s5 = inlined_call_operand.vmem [shape: f32[32,8], index: 5, kind: input, shape index: {}]   ;;  %s532_s6 = inlined_call_operand.vmem [shape: f32[1,8], index: 6, kind: input, shape index: {}]   ;;  %s533_s7 = inlined_call_operand.hbm [shape: f32[8,8], index: 7, kind: output, shape index: {}]  }
   0x1   :  { %v28_v0 = vld [vmem:[%s527_s1] sm:$0xff]  ;;  %v29_v1 = vld [vmem:[%s527_s1 + $0x8] sm:$0xff]  ;;  %364 = vmatprep.subr.bf16.mxu0 %v413_v2  ;;  %331 = vmatprep.mubr.msk.f32.mxu0 %vm414_vm0, %v415_v4  ;;  %v114_v7 = vld [vmem:[%s529_s3 + $0x10] sm:$0xff] }
   0x2   :  { %v365_v3 = vpack.c.bf16 %v29_v1, %v28_v0  ;;  %v112_v5 = vld [vmem:[%s529_s3] sm:$0xff]  ;;  %v113_v6 = vld [vmem:[%s529_s3 + $0x8] sm:$0xff]  ;;  %367 = vmatprep.subr.bf16.mxu1 %v413_v2  ;;  %v115_v9 = vld [vmem:[%s529_s3 + $0x18] sm:$0xff]  ;;  %350 = vmatprep.mubr.msk.f32.mxu1 %vm414_vm0, %v415_v4 }
   0x3   :  { %v368_v8 = vpack.c.bf16 %v113_v6, %v112_v5  ;;  %v27_v10 = vld [vmem:[%s526_s0] sm:$0xff] }
   0x4   :  { %366 = vmatpush3.bf16.msra.mxu0 %v365_v3 }
   0x5   :  { %12 = vsyncpa [#allocation3], 0  ;;  %369 = vmatpush3.bf16.msra.mxu1 %v368_v8  ;;  %v371_v11 = vpack.c.bf16 %v115_v9, %v114_v7  ;;  %379 = vmatprep.subr.bf16.mxu0 %v413_v2  ;;  %v116_v12 = vld [vmem:[%s529_s3 + $0x20] sm:$0xff]  ;;  %v117_v13 = vld [vmem:[%s529_s3 + $0x28] sm:$0xff]  ;;  %vm127_vm2 = vcmask 523264   ;;  %vm213_vm3 = vcmask 261120  }
   0x6   :  { %370 = vmatprep.subr.bf16.mxu1 %v413_v2  ;;  %v374_v14 = vpack.c.bf16 %v117_v13, %v116_v12  ;;  %v118_v15 = vld [vmem:[%s529_s3 + $0x30] sm:$0xff]  ;;  %v119_v16 = vld [vmem:[%s529_s3 + $0x38] sm:$0xff]  ;;  %v202_v18 = vld [vmem:[%s531_s5] sm:$0xff]  ;;  %s416_s10 = smov [#allocation2]   ;;  %vm288_vm4 = vcmask 64512  }
   0x7   :  { %332 = vmatmul.mubr.msk.f32.vlgmr.msra.gmra.mrb[0].mxu0 %vm37_vm1, %v27_v10  ;;  %v377_v17 = vpack.c.bf16 %v119_v16, %v118_v15  ;;  %v203_v19 = vld [vmem:[%s531_s5 + $0x8] sm:$0xff]  ;;  %v304_v21 = vld [vmem:[%s528_s2] ss:$0 sm:$0xff]  ;;  %v204_v26 = vld [vmem:[%s531_s5 + $0x10] sm:$0xff]  ;;  %s296_s1 = sshll.u32 %s416_s10, 4  ;;  %s297_s1 = int_to_ptr.vmem [resolvable:$true] %s296_s1 }
   0x8   :  { %361 = vmatprep.mubr.msk.f32.mxu0 %vm414_vm0, %v415_v4  ;;  %v380_v20 = vpack.c.bf16 %v203_v19, %v202_v18  ;;  %v205_v27 = vld [vmem:[%s531_s5 + $0x18] sm:$0xff]  ;;  %v306_v29 = vld [vmem:[%s530_s4] ss:$0 sm:$0xff]  ;;  %s389_s4 = scalar_lea.vmem %s297_s1, 128  ;;  %p394_p1 = scmp.lt.s32.totalorder %s297_s1, %s297_s1 }
   0x9   :  { %372 = vmatpush3.bf16.msra.mxu1 %v371_v11  ;;  %v383_v28 = vpack.c.bf16 %v205_v27, %v204_v26  ;;  %v308_v34 = vld [vmem:[%s532_s6] ss:$0 sm:$0xff]  ;;  %p390_p0 = scmp.ne.s32.totalorder %s297_s1, %s389_s4  ;;  %p395_p2 = scmp.lt.s32.totalorder %s389_s4, %s389_s4 }
   0xa   :  { %373 = vmatprep.subr.bf16.mxu1 %v413_v2  ;;  %381 = vmatpush3.bf16.msra.mxu0 %v380_v20 }
   0xb   :  { %382 = vmatprep.subr.bf16.mxu0 %v413_v2  ;;  %p396_p3 = por %p395_p2, %p394_p1 }
   0xd   :  { %375 = vmatpush3.bf16.msra.mxu1 %v374_v14  ;;  %p397_p4 = pnand %p396_p3, %p390_p0 }
   0xe   :  { %376 = vmatprep.subr.bf16.mxu1 %v413_v2  ;;  %384 = vmatpush3.bf16.msra.mxu0 %v383_v28 }
  0x11   :  { %378 = vmatpush3.bf16.msra.mxu1 %v377_v17 }
  0xda   :  { %v107_v22 = vpop.f32.mrb[0].mxu0 }
  0xdb   :  { %v108_v23 = vadd.f32 %v304_v21, %v107_v22  ;;  %v333_v24 = vpop.f32.mrb[1].mxu0 }
  0xdd   :  { %v111_v25 = vmax.f32 %v108_v23, 0.0 }
  0xdf   :  { %351 = vmatmul.mubr.msk.f32.vlgmr.msra.gmra.mrb[0].mxu1 %vm127_vm2, %v111_v25 }
 0x1b2   :  { %v197_v30 = vpop.f32.mrb[0].mxu1 }
 0x1b3   :  { %v198_v31 = vadd.f32 %v306_v29, %v197_v30  ;;  %v352_v32 = vpop.f32.mrb[1].mxu1 }
 0x1b5   :  { %v201_v33 = vmax.f32 %v198_v31, 0.0 }
 0x1b7   :  { %362 = vmatmul.mubr.msk.f32.vlgmr.msra.gmra.mrb[2].mxu0 %vm213_vm3, %v201_v33 }
 0x28a   :  { %v283_v35 = vpop.f32.mrb[2].mxu0 }
 0x28b   :  { %v284_v36 = vadd.f32 %v308_v34, %v283_v35  ;;  %v363_v37 = vpop.f32.mrb[3].mxu0 }
 0x28d   :  { %v287_v38 = vmax.f32 %v284_v36, 0.0 }
 0x28f   :  { %289 = vst.msk [vmem:[#allocation2] sm:$0xff] %vm288_vm4, %v287_v38 }
 0x290   :  { %400 = shalt.err (!%p397_p4)
}
 0x291   :  { %s401_s6 = scalar_lea.hbm %s533_s7, 128 }
 0x292   :  { %p402_p5 = scmp.ne.s32.totalorder %s533_s7, %s401_s6  ;;  %p405_p6 = scmp.lt.u32.totalorder %s401_s6, %s533_s7 }
 0x294   :  { %p407_p7 = pnand %p405_p6, %p402_p5 }
 0x296   :  { %410 = shalt.err (!%p407_p7)
}
 0x297   :  { %299 = dma.vmem_to_hbm [thread:$0]  %s297_s1, 128, %s533_s7, [#allocation3]  }
 0x298   :  { %411 = dma.done.wait [#allocation3], 128  }
 0x299   :  { %412 = vsyncadd [#allocation3], 4294967168 }
 0x29a   :  { %303 = vsyncpa [#allocation3], 1 }

</bundles_post_ra>
